<compile_context>
chip_gen: v7x
topology: tpu7x:2x2x1
jax: 0.10.0
libtpu: 0.0.40
codegen_flags: <defaults>
</compile_context>

<pallas_src>
import jax
import jax.numpy as jnp
from jax.experimental import pallas as pl
from jax.experimental.pallas import tpu as pltpu


# ---------------------------------------------------------------------------
# Kernel
# ---------------------------------------------------------------------------
def _quantize_kernel(x_ref, w_ref, w2_ref, q_ref, idx_ref):
    """x_ref: (D, TN) NCHW column tile; w_ref: (K, D); w2_ref: (K, 1) = |w_k|^2.

    Writes q_ref: (D, TN) quantized columns, idx_ref: (1, TN) int32 indices.
    """
    x = x_ref[...]                       # native dtype (no upcast before MXU)
    w = w_ref[...]
    w2 = w2_ref[...]                     # (K, 1) f32

    # cross[k, n] = sum_d w[k, d] * x[d, n]   (MXU, contracting D, no transpose)
    xw = jax.lax.dot_general(
        w, x, dimension_numbers=(((1,), (0,)), ((), ())),
        preferred_element_type=jnp.float32)                      # (K, TN) f32

    # |x_n|^2 is constant along k, so argmin_k(|x|^2 - 2 x.w_k + |w_k|^2)
    # == argmin_k(|w_k|^2 - 2 x.w_k).
    score = w2 - 2.0 * xw                                        # (K, TN) f32

    k, tn = score.shape
    row = jax.lax.broadcasted_iota(jnp.int32, (k, tn), 0)
    min_s = jnp.min(score, axis=0, keepdims=True)                # (1, TN)
    # First-occurrence argmin (matches torch.max(-dist, 1)[1]).  NaN input rows
    # would match nothing and yield idx == K with a zero quantized column.
    idx = jnp.min(jnp.where(score == min_s, row, k), axis=0)     # (TN,) int32

    # One-hot gather of the selected codebook rows on the MXU (exact: 0/1 are
    # representable in any dtype; contraction accumulates in f32).
    onehot = (row == idx[None, :]).astype(w.dtype)               # (K, TN)
    q = jax.lax.dot_general(
        w, onehot, dimension_numbers=(((0,), (0,)), ((), ())),
        preferred_element_type=jnp.float32)                      # (D, TN)

    q_ref[...] = q.astype(q_ref.dtype)
    idx_ref[...] = idx[None, :].astype(jnp.int32)                # lane-dense


# ---------------------------------------------------------------------------
# Tiling / wrapper
# ---------------------------------------------------------------------------
def _choose_tile_hw(hw: int, d: int, itemsize: int,
                    budget_bytes: int = 8 * 1024 * 1024) -> int:
    """Largest HW tile under a VMEM byte budget (x + q tiles, double-buffered)."""
    bytes_per_col = 2 * 2 * d * max(itemsize, 4)   # 2 arrays x 2 buffers, f32-safe
    max_cols = max(128, budget_bytes // bytes_per_col)
    if hw <= max_cols:
        return hw                                   # single tile per batch image
    # Largest multiple-of-128 divisor of hw that fits (no wrapper-side padding).
    t = (max_cols // 128) * 128
    while t >= 128:
        if hw % t == 0:
            return t
        t -= 128
    # TODO(synk): no multiple-of-128 divisor fits the soft budget; fall back to
    # the full extent (correct, may exceed the soft budget for exotic shapes).
    return hw


def _quantize_nchw(z3, weight):
    """z3: (B, D, HW) NCHW-flattened input, weight: (K, D) codebook.

    Returns (quantized (B, D, HW) in weight dtype, indices (B, 1, HW) int32).
    """
    b, d, hw = z3.shape
    k = weight.shape[0]

    tile_hw = _choose_tile_hw(hw, d, z3.dtype.itemsize)
    n_hw_tiles = hw // tile_hw

    # Grid-invariant |w_k|^2, hoisted out of the kernel body (fetched once).
    w2 = jnp.sum(weight.astype(jnp.float32) ** 2, axis=1, keepdims=True)  # (K,1)

    cost = pl.CostEstimate(
        flops=4 * b * hw * d * k,          # distance matmul + one-hot gather
        transcendentals=0,
        bytes_accessed=(b * hw * d * z3.dtype.itemsize        # x read
                        + b * hw * d * weight.dtype.itemsize  # q write
                        + b * hw * 4                          # idx write
                        + k * d * weight.dtype.itemsize + k * 4),
    )

    q, idx = pl.pallas_call(
        _quantize_kernel,
        out_shape=(
            jax.ShapeDtypeStruct((b, d, hw), weight.dtype),
            jax.ShapeDtypeStruct((b, 1, hw), jnp.int32),
        ),
        grid_spec=pltpu.PrefetchScalarGridSpec(
            num_scalar_prefetch=0,
            grid=(b, n_hw_tiles),
            in_specs=[
                pl.BlockSpec((None, d, tile_hw), lambda ib, it: (ib, 0, it)),  # x
                pl.BlockSpec((k, d), lambda ib, it: (0, 0)),                   # W
                pl.BlockSpec((k, 1), lambda ib, it: (0, 0)),                   # |w|^2
            ],
            out_specs=[
                pl.BlockSpec((None, d, tile_hw), lambda ib, it: (ib, 0, it)),  # q
                pl.BlockSpec((None, 1, tile_hw), lambda ib, it: (ib, 0, it)),  # idx
            ],
        ),
        compiler_params=pltpu.CompilerParams(
            # Both axes independent; on v7x they shard across the two
            # TensorCores, on v5e/v6e they are cheap sequential steps.
            dimension_semantics=("parallel", "parallel"),
            vmem_limit_bytes=32 * 1024 * 1024,
        ),
        cost_estimate=cost,
    )(z3, weight, w2)

    return q, idx


# ---------------------------------------------------------------------------
# Straight-through estimator: forward value is exactly `quantized`; gradient of
# the second output flows to z (identity), matching (quantized - z).detach() + z
# without paying extra full-tensor elementwise passes in the forward path.
# ---------------------------------------------------------------------------
@jax.custom_vjp
def _straight_through(z, quantized):
    return quantized


def _st_fwd(z, quantized):
    return quantized, None


def _st_bwd(_, g):
    return g, jnp.zeros_like(g)


_straight_through.defvjp(_st_fwd, _st_bwd)


@jax.jit
def quantize_forward(z, weight):
    """Forward pass of the Quantize module.

    z: (b, c, h, w) NCHW with c == code_dim; weight: (size, code_dim).
    Returns (quantized, straight_through, encoding_indices) like PyTorch.
    """
    b, c, h, w = z.shape
    code_dim = weight.shape[1]
    assert c == code_dim

    # Free reshape (collapses trailing contiguous dims) — no transpose, no pad.
    z3 = z.reshape(b, c, h * w)
    q3, idx3 = _quantize_nchw(z3, weight)

    quantized = q3.reshape(b, c, h, w)
    encoding_indices = idx3.reshape(b, h, w)
    straight_through = _straight_through(z, quantized.astype(z.dtype))
    return quantized, straight_through, encoding_indices


# ---------------------------------------------------------------------------
# Pure-JAX reference mirroring the PyTorch module (also returns distances).
# ---------------------------------------------------------------------------
def _reference_forward(z, weight):
    b, c, h, w = z.shape
    code_dim = weight.shape[1]
    flat_inputs = jnp.transpose(z, (0, 2, 3, 1)).reshape(-1, code_dim)
    distances = (
        jnp.sum(flat_inputs ** 2, axis=1, keepdims=True)
        - 2.0 * flat_inputs @ weight.T
        + jnp.sum(weight.T ** 2, axis=0, keepdims=True)
    )
    encoding_indices = jnp.argmax(-distances, axis=1).reshape(b, h, w)
    quantized = jnp.transpose(weight[encoding_indices], (0, 3, 1, 2))
    return quantized, encoding_indices, distances


if __name__ == "__main__":
    # Module config: Quantize(size=64, code_dim=32); input z: (2, 32, 16, 16)
    size = 64
    code_dim = 32
    b, h, w = 2, 16, 16

    key = jax.random.PRNGKey(0)
    k_w, k_z = jax.random.split(key)
    # Deterministic init matching nn.Embedding.weight.data.uniform_(-1/size, 1/size)
    weight = jax.random.uniform(
        k_w, (size, code_dim), dtype=jnp.float32,
        minval=-1.0 / size, maxval=1.0 / size)
    z = jax.random.normal(k_z, (b, code_dim, h, w), dtype=jnp.float32)

    quantized, straight_through, encoding_indices = quantize_forward(z, weight)
    jax.block_until_ready((quantized, straight_through, encoding_indices))

    # ---- correctness checks against the pure-JAX reference -----------------
    q_ref, idx_ref, dist_ref = _reference_forward(z, weight)

    idx_k = encoding_indices.reshape(-1)
    idx_r = idx_ref.reshape(-1).astype(idx_k.dtype)
    if not bool(jnp.all(idx_k == idx_r)):
        # Any disagreement must correspond to a numerical near-tie in the
        # reference distances (different rounding paths on near-equal codes).
        rows = jnp.arange(dist_ref.shape[0])
        gap = dist_ref[rows, idx_k] - jnp.min(dist_ref, axis=1)
        assert bool(jnp.all(gap <= 1e-4)), "kernel picked a non-minimal code"

    # Quantized output must be exactly the codebook rows the kernel selected.
    gathered = jnp.transpose(weight[encoding_indices], (0, 3, 1, 2))
    assert jnp.allclose(quantized, gathered, atol=1e-6, rtol=1e-6)
    assert jnp.allclose(straight_through, quantized, atol=1e-5, rtol=1e-5)
    assert quantized.shape == z.shape
    assert encoding_indices.shape == (b, h, w)
    assert encoding_indices.dtype == jnp.int32

    print("KERNEL_OK")
</pallas_src>

<mosaic_0001>
module attributes {stable_mosaic.version = 11 : i64} {
  func.func @_quantize_kernel(%arg0: i32, %arg1: i32, %arg2: memref<1x32x256xf32, #tpu.memory_space<vmem>>, %arg3: memref<64x32xf32, #tpu.memory_space<vmem>>, %arg4: memref<64x1xf32, #tpu.memory_space<vmem>>, %arg5: memref<1x32x256xf32, #tpu.memory_space<vmem>>, %arg6: memref<1x1x256xi32, #tpu.memory_space<vmem>>) attributes {dimension_semantics = [#tpu.dimension_semantics<parallel>, #tpu.dimension_semantics<parallel>], iteration_bounds = array<i64: 2, 1>, scalar_prefetch = 0 : i64, scratch_operands = 0 : i64, tpu.core_type = #tpu.core_type<tc>, window_params = [{transform_indices = @transform_0, window_bounds = array<i64: 1, 32, 256>}, {pipeline_mode = #tpu.pipeline_mode<synchronous>, transform_indices = @transform_1, window_bounds = array<i64: 64, 32>}, {pipeline_mode = #tpu.pipeline_mode<synchronous>, transform_indices = @transform_2, window_bounds = array<i64: 64, 1>}, {transform_indices = @transform_3, window_bounds = array<i64: 1, 32, 256>}, {transform_indices = @transform_4, window_bounds = array<i64: 1, 1, 256>}]} {
    %c0 = arith.constant 0 : index
    %c0_0 = arith.constant 0 : index
    %c0_1 = arith.constant 0 : index
    %0 = vector.load %arg2[%c0, %c0_0, %c0_1] : memref<1x32x256xf32, #tpu.memory_space<vmem>>, vector<1x32x256xf32>
    %1 = vector.shape_cast %0 : vector<1x32x256xf32> to vector<32x256xf32>
    %c0_2 = arith.constant 0 : index
    %c0_3 = arith.constant 0 : index
    %2 = vector.load %arg3[%c0_2, %c0_3] : memref<64x32xf32, #tpu.memory_space<vmem>>, vector<64x32xf32>
    %c0_4 = arith.constant 0 : index
    %c0_5 = arith.constant 0 : index
    %3 = vector.load %arg4[%c0_4, %c0_5] : memref<64x1xf32, #tpu.memory_space<vmem>>, vector<64x1xf32>
    %cst = arith.constant dense<0.000000e+00> : vector<64x256xf32>
    %4 = tpu.matmul %2, %1, %cst {dimension_numbers = #tpu.dot_dimension_numbers<[1], [0], [0], [1], [0, 0, 1, 1], [], []>} : vector<64x32xf32>, vector<32x256xf32>, vector<64x256xf32> -> vector<64x256xf32>
    %cst_6 = arith.constant 2.000000e+00 : f32
    %5 = vector.broadcast %cst_6 : f32 to vector<64x256xf32>
    %6 = arith.mulf %5, %4 : vector<64x256xf32>
    %7 = vector.broadcast %3 : vector<64x1xf32> to vector<64x256xf32>
    %8 = arith.subf %7, %6 : vector<64x256xf32>
    %9 = tpu.iota {dimensions = array<i32: 0>} : vector<64x256xi32>
    %cst_7 = arith.constant dense<0x7F800000> : vector<256xf32>
    %10 = vector.multi_reduction <minimumf>, %8, %cst_7 [0] : vector<64x256xf32> to vector<256xf32>
    %11 = vector.shape_cast %10 : vector<256xf32> to vector<1x256xf32>
    %12 = vector.broadcast %11 : vector<1x256xf32> to vector<64x256xf32>
    %13 = arith.cmpf oeq, %8, %12 : vector<64x256xf32>
    %c64_i32 = arith.constant 64 : i32
    %14 = vector.broadcast %c64_i32 : i32 to vector<64x256xi32>
    %15 = arith.select %13, %9, %14 : vector<64x256xi1>, vector<64x256xi32>
    %cst_8 = arith.constant dense<2147483647> : vector<256xi32>
    %16 = vector.multi_reduction <minsi>, %15, %cst_8 [0] : vector<64x256xi32> to vector<256xi32>
    %17 = vector.shape_cast %16 : vector<256xi32> to vector<1x256xi32>
    %18 = vector.broadcast %17 : vector<1x256xi32> to vector<64x256xi32>
    %19 = arith.cmpi eq, %9, %18 : vector<64x256xi32>
    %20 = arith.extui %19 : vector<64x256xi1> to vector<64x256xi32>
    %21 = arith.sitofp %20 : vector<64x256xi32> to vector<64x256xf32>
    %cst_9 = arith.constant dense<0.000000e+00> : vector<32x256xf32>
    %22 = tpu.matmul %2, %21, %cst_9 {dimension_numbers = #tpu.dot_dimension_numbers<[0], [0], [1], [1], [0, 1, 1, 1], [], []>} : vector<64x32xf32>, vector<64x256xf32>, vector<32x256xf32> -> vector<32x256xf32>
    %c0_10 = arith.constant 0 : index
    %c0_11 = arith.constant 0 : index
    %c0_12 = arith.constant 0 : index
    %23 = vector.load %arg5[%c0_10, %c0_11, %c0_12] : memref<1x32x256xf32, #tpu.memory_space<vmem>>, vector<1x32x256xf32>
    %24 = vector.shape_cast %23 : vector<1x32x256xf32> to vector<32x256xf32>
    %25 = vector.shape_cast %22 : vector<32x256xf32> to vector<1x32x256xf32>
    tpu.vector_store %arg5[%c0_10, %c0_11, %c0_12], %25 {strides = array<i32>} : memref<1x32x256xf32, #tpu.memory_space<vmem>>, vector<1x32x256xf32>,
    %26 = vector.shape_cast %16 : vector<256xi32> to vector<1x256xi32>
    %c0_13 = arith.constant 0 : index
    %c0_14 = arith.constant 0 : index
    %c0_15 = arith.constant 0 : index
    %27 = vector.load %arg6[%c0_13, %c0_14, %c0_15] : memref<1x1x256xi32, #tpu.memory_space<vmem>>, vector<1x1x256xi32>
    %28 = vector.shape_cast %27 : vector<1x1x256xi32> to vector<1x256xi32>
    %29 = vector.shape_cast %26 : vector<1x256xi32> to vector<1x1x256xi32>
    tpu.vector_store %arg6[%c0_13, %c0_14, %c0_15], %29 {strides = array<i32>} : memref<1x1x256xi32, #tpu.memory_space<vmem>>, vector<1x1x256xi32>,
    return
  }
  func.func @transform_0(%arg0: i32, %arg1: i32) -> (i32, i32, i32) {
    %c0_i32 = arith.constant 0 : i32
    %c0_i32_0 = arith.constant 0 : i32
    return %arg0, %c0_i32, %arg1 : i32, i32, i32
  }
  func.func @transform_1(%arg0: i32, %arg1: i32) -> (i32, i32) {
    %c0_i32 = arith.constant 0 : i32
    %c0_i32_0 = arith.constant 0 : i32
    %c0_i32_1 = arith.constant 0 : i32
    return %c0_i32, %c0_i32_0 : i32, i32
  }
  func.func @transform_2(%arg0: i32, %arg1: i32) -> (i32, i32) {
    %c0_i32 = arith.constant 0 : i32
    %c0_i32_0 = arith.constant 0 : i32
    %c0_i32_1 = arith.constant 0 : i32
    return %c0_i32, %c0_i32_0 : i32, i32
  }
  func.func @transform_3(%arg0: i32, %arg1: i32) -> (i32, i32, i32) {
    %c0_i32 = arith.constant 0 : i32
    %c0_i32_0 = arith.constant 0 : i32
    return %arg0, %c0_i32, %arg1 : i32, i32, i32
  }
  func.func @transform_4(%arg0: i32, %arg1: i32) -> (i32, i32, i32) {
    %c0_i32 = arith.constant 0 : i32
    %c0_i32_0 = arith.constant 0 : i32
    return %arg0, %c0_i32, %arg1 : i32, i32, i32
  }
}

</mosaic_0001>

<bundles_post_ra>
// kernel: quantize_forward.1
= control target key start
LH: loop header
LB: loop body
LE: loop exit
PB: predicated region body
PF: predicated region fallthrough
CT: control target
= control target key end

     0   :  { %s1112_s15 = smov 0   ;;  %s1114_s16 = smov 0   ;;  %s1350_s0 = inlined_call_operand.vmem [shape: f32[2,32,256], index: 0, kind: input, shape index: {}]   ;;  %s1351_s1 = inlined_call_operand.vmem [shape: f32[64,32], index: 1, kind: input, shape index: {}]   ;;  %s1352_s2 = inlined_call_operand.vmem [shape: f32[64,1], index: 2, kind: input, shape index: {}]   ;;  %s1353_s3 = inlined_call_operand.vmem [shape: f32[2,32,256], index: 3, kind: output, shape index: {0}]   ;;  %s1354_s4 = inlined_call_operand.vmem [shape: s32[2,1,256], index: 4, kind: output, shape index: {1}]  }
   0x1   :  { %s1116_s17 = smov 0  }
   0x2 LB: > { %s27_s18 = sadd.s32 1, %s1077_s16  ;;  %p951_p0 = scmp.ge.s32.totalorder %s1081_s17, 1  ;;  %s1081_s17 = sphi %s1116_s17, %s15_s17   ;;  %s1077_s16 = sphi %s1114_s16, %s1356_s16   ;;  %s1073_s15 = sphi %s1112_s15, %s1355_s15  }
   0x3   : > { %p29_p1 = scmp.ge.s32.totalorder %s27_s18, 2  ;;  %p188_p2 = scmp.lt.s32.totalorder %s1081_s17, 3 }
   0x5   : > { %s1358_s18 = smov (%p29_p1, %s27_s18), 0  ;;  %p189_p3 = pnand %p951_p0, %p188_p2 }
   0x6   : > { %p231_p4 = scmp.lt.s32.totalorder (!%p189_p3), %s1073_s15, 1  ;;  %v1083_v0 = vmov (!%p189_p3), 0.0   ;;  %v1084_v1 = vmov (!%p189_p3), 0   ;;  %v275_v2 = vld [vmem:[%s1352_s2] sm:$0xff] (!%p189_p3)  ;;  %v277_v3 = vld [vmem:[%s1352_s2 + $0x10] sm:$0xff] (!%p189_p3)  ;;  %v276_v4 = vld [vmem:[%s1352_s2 + $0x8] sm:$0xff] (!%p189_p3) }
   0x7   : > { %192 = sbr.rel (%p189_p3) target bundleno = 562 (0x232), region = 32  ;;  %372 = vmatprep.mubr.f32.mxu0 (!%p189_p3), %v1083_v0  ;;  %763 = vmatprep.mubr.f32.mxu1 (!%p189_p3), %v1083_v0  ;;  %v278_v5 = vld [vmem:[%s1352_s2 + $0x18] sm:$0xff] (!%p189_p3)  ;;  %v279_v17 = vld [vmem:[%s1352_s2 + $0x20] sm:$0xff] (!%p189_p3)  ;;  %v280_v18 = vld [vmem:[%s1352_s2 + $0x28] sm:$0xff] (!%p189_p3)  ;;  %vm283_vm0 = vcmask (!%p189_p3), 261120  }
   0x8   : > { %1057 = vset.pattern.permute.xlu0 (!%p189_p3), %v1084_v1  ;;  %1058 = vset.pattern.permute.xlu1 (!%p189_p3), %v1084_v1  ;;  %v281_v20 = vld [vmem:[%s1352_s2 + $0x30] sm:$0xff] (!%p189_p3)  ;;  %v282_v21 = vld [vmem:[%s1352_s2 + $0x38] sm:$0xff] (!%p189_p3)  ;;  %v267_v22 = vld [vmem:[%s1351_s1] sm:$0xff] (!%p189_p3) }
   0x9   : > { %439 = vperm.xlu0 (!%p189_p3), %1057, %v275_v2   ;;  %449 = vperm.xlu1 (!%p189_p3), %1058, %v277_v3   ;;  %v268_v23 = vld [vmem:[%s1351_s1 + $0x8] sm:$0xff] (!%p189_p3)  ;;  %v269_v24 = vld [vmem:[%s1351_s1 + $0x10] sm:$0xff] (!%p189_p3)  ;;  %v270_v25 = vld [vmem:[%s1351_s1 + $0x18] sm:$0xff] (!%p189_p3) }
   0xa   : > { %v271_v26 = vld [vmem:[%s1351_s1 + $0x20] sm:$0xff] (!%p189_p3)  ;;  %v272_v27 = vld [vmem:[%s1351_s1 + $0x28] sm:$0xff] (!%p189_p3)  ;;  %v273_v28 = vld [vmem:[%s1351_s1 + $0x30] sm:$0xff] (!%p189_p3) }
   0xb   : > { %v274_v29 = vld [vmem:[%s1351_s1 + $0x38] sm:$0xff] (!%p189_p3) }
   0xd   : > { %444 = vperm.xlu0 (!%p189_p3), %1057, %v276_v4   ;;  %454 = vperm.xlu1 (!%p189_p3), %1058, %v278_v5  }
   0xe   : > { %s1360_s15 = smov (!%p231_p4, %s1073_s15), 1 }
   0xf   : > { %s1003_s23 = sshll.u32 %s1360_s15, 6  ;;  %s956_s8 = sshll.u32 %s1360_s15, 1 }
  0x10   : > { %s238_s28 = scalar_lea.vmem %s1350_s0, %s1003_s23  ;;  %s257_s11 = scalar_lea.vmem %s1354_s4, %s956_s8 }
  0x11   : > { %v260_v6 = vld [vmem:[%s238_s28 + $0x8] sm:$0xff]  ;;  %v262_v7 = vld [vmem:[%s238_s28 + $0x18] sm:$0xff]  ;;  %v259_v8 = vld [vmem:[%s238_s28] sm:$0xff]  ;;  %459 = vperm.xlu0 %1057, %v279_v17   ;;  %464 = vperm.xlu1 %1058, %v280_v18   ;;  %s248_s14 = scalar_lea.vmem %s1353_s3, %s1003_s23 }
  0x12   : > { %v1005_v9 = vpack.c.bf16 %v262_v7, %v260_v6  ;;  %v261_v10 = vld [vmem:[%s238_s28 + $0x10] sm:$0xff]  ;;  %v264_v11 = vld [vmem:[%s238_s28 + $0x28] sm:$0xff]  ;;  %v266_v12 = vld [vmem:[%s238_s28 + $0x38] sm:$0xff] }
  0x13   : > { %v1007_v13 = vpack.c.bf16 %v261_v10, %v259_v8  ;;  %v1009_v14 = vpack.c.bf16 %v266_v12, %v264_v11  ;;  %v263_v15 = vld [vmem:[%s238_s28 + $0x20] sm:$0xff]  ;;  %v265_v16 = vld [vmem:[%s238_s28 + $0x30] sm:$0xff] }
  0x14   : > { %1006 = vmatprep.subr.bf16.mxu0 %v1005_v9  ;;  %v1011_v19 = vpack.c.bf16 %v265_v16, %v263_v15 }
  0x15   : > { %1008 = vmatpush1.bf16.msra.mxu0 %v1007_v13  ;;  %469 = vperm.xlu0 %1057, %v281_v20  }
  0x16   : > { %1010 = vmatprep.subr.bf16.mxu0 %v1009_v14  ;;  %474 = vperm.xlu1 %1058, %v282_v21  }
  0x19   : > { %1012 = vmatpush1.bf16.msra.mxu0 %v1011_v19 }
  0x1c   : > { %957 = vmatmul.mubr.msk.f32.vlgmr.msra.gmra.mrb[0].mxu0 %vm283_vm0, %v267_v22 }
  0x1d   : > { %378 = vmatprep.mubr.f32.mxu0 %v1083_v0 }
  0x20   : > { %958 = vmatmul.mubr.msk.f32.gmra.mrb[2].mxu0 %vm283_vm0, %v268_v23 }
  0x21   : > { %384 = vmatprep.mubr.f32.mxu0 %v1083_v0 }
  0x24   : > { %959 = vmatmul.mubr.msk.f32.gmra.mrb[4].mxu0 %vm283_vm0, %v269_v24 }
  0x25   : > { %390 = vmatprep.mubr.f32.mxu0 %v1083_v0 }
  0x28   : > { %960 = vmatmul.mubr.msk.f32.gmra.mrb[6].mxu0 %vm283_vm0, %v270_v25 }
  0x29   : > { %396 = vmatprep.mubr.f32.mxu0 %v1083_v0 }
  0x2c   : > { %961 = vmatmul.mubr.msk.f32.gmra.mrb[8].mxu0 %vm283_vm0, %v271_v26 }
  0x2d   : > { %402 = vmatprep.mubr.f32.mxu0 %v1083_v0 }
  0x30   : > { %962 = vmatmul.mubr.msk.f32.gmra.mrb[10].mxu0 %vm283_vm0, %v272_v27 }
  0x31   : > { %408 = vmatprep.mubr.f32.mxu0 %v1083_v0 }
  0x33   : > { %654 = vxpose.xlu0.b32.start [1/8] (short) (narrow) %v267_v22, 32 }
  0x34   : > { %963 = vmatmul.mubr.msk.f32.gmra.mrb[12].mxu0 %vm283_vm0, %v273_v28 }
  0x35   : > { %414 = vmatprep.mubr.f32.mxu0 %v1083_v0 }
  0x37   : > { %655 = vxpose.xlu0.b32.cont [2/8] (short) (narrow) %v268_v23, 32 }
  0x38   : > { %964 = vmatmul.mubr.msk.f32.gmra.mrb[14].mxu0 %vm283_vm0, %v274_v29 }
  0x3b   : > { %656 = vxpose.xlu0.b32.cont [3/8] (short) (narrow) %v269_v24, 32 }
  0x3f   : > { %657 = vxpose.xlu0.b32.cont [4/8] (short) (narrow) %v270_v25, 32 }
  0x43   : > { %658 = vxpose.xlu0.b32.cont [5/8] (short) (narrow) %v271_v26, 32 }
  0x47   : > { %659 = vxpose.xlu0.b32.cont [6/8] (short) (narrow) %v272_v27, 32 }
  0x4b   : > { %660 = vxpose.xlu0.b32.cont [7/8] (short) (narrow) %v273_v28, 32 }
  0x4f   : > { %661 = vxpose.xlu0.b32.end [8/8] (short) (narrow) %v274_v29, 32 }
  0x88   : > { %v440_v34 = vpop.permute.xlu0 %439  ;;  %v450_v37 = vpop.permute.xlu1 %449 }
  0x8c   : > { %v445_v47 = vpop.permute.xlu0 %444  ;;  %v455_v54 = vpop.permute.xlu1 %454 }
  0x90   : > { %v460_v2 = vpop.permute.xlu0 %459  ;;  %v465_v10 = vpop.permute.xlu1 %464 }
  0x94   : > { %v470_v19 = vpop.permute.xlu0 %469 }
  0x95   : > { %v475_v28 = vpop.permute.xlu1 %474 }
  0xef   : > { %v374_v30 = vpop.f32.mrb[0].mxu0 }
  0xf0   : > { %v376_v31 = vpop.f32.mrb[1].mxu0  ;;  %v421_v35 = vmul.f32 2.0, %v374_v30 }
  0xf1   : > { %v422_v36 = vmul.f32 2.0, %v376_v31 }
  0xf2   : > { %v1203_v42 = vsub.f32 %v440_v34, %v421_v35 }
  0xf3   : > { %v380_v32 = vpop.f32.mrb[2].mxu0  ;;  %v1207_v45 = vsub.f32 %v440_v34, %v422_v36 }
  0xf4   : > { %v382_v33 = vpop.f32.mrb[3].mxu0  ;;  %v423_v43 = vmul.f32 2.0, %v380_v32 }
  0xf5   : > { %v424_v46 = vmul.f32 2.0, %v382_v33 }
  0xf6   : > { %v1215_v56 = vsub.f32 %v445_v47, %v423_v43 }
  0xf7   : > { %v386_v38 = vpop.f32.mrb[4].mxu0  ;;  %v1219_v58 = vsub.f32 %v445_v47, %v424_v46 }
  0xf8   : > { %v425_v39 = vmul.f32 2.0, %v386_v38  ;;  %v388_v40 = vpop.f32.mrb[5].mxu0  ;;  %v493_v38 = vlaneseq }
  0xf9   : > { %v426_v41 = vmul.f32 2.0, %v388_v40 }
  0xfa   : > { %v1205_v44 = vsub.f32 %v450_v37, %v425_v39  ;;  %v1243_v46 = vshrl.u32 %v493_v38, 7 }
  0xfb   : > { %v1209_v48 = vsub.f32 %v450_v37, %v426_v41  ;;  %v392_v49 = vpop.f32.mrb[6].mxu0 }
  0xfc   : > { %v502_v50 = vmin.f32 %v1203_v42, %v1205_v44  ;;  %v427_v51 = vmul.f32 2.0, %v392_v49  ;;  %v394_v52 = vpop.f32.mrb[7].mxu0 }
  0xfd   : > { %v515_v53 = vmin.f32 %v1207_v45, %v1209_v48  ;;  %v428_v55 = vmul.f32 2.0, %v394_v52  ;;  %v1246_v52 = vadd.s32 8, %v1243_v46 }
  0xfe   : > { %v1217_v57 = vsub.f32 %v455_v54, %v427_v51 }
  0xff   : > { %v1221_v59 = vsub.f32 %v455_v54, %v428_v55  ;;  %v398_v60 = vpop.f32.mrb[8].mxu0  ;;  %v1249_v54 = vadd.s32 16, %v1243_v46  ;;  %v1252_v55 = vadd.s32 24, %v1243_v46 }
 0x100   : > { %v503_v61 = vmin.f32 %v1215_v56, %v1217_v57  ;;  %v429_v62 = vmul.f32 2.0, %v398_v60  ;;  %v400_v63 = vpop.f32.mrb[9].mxu0  ;;  %v1255_v60 = vadd.s32 32, %v1243_v46 }
 0x101   : > { %v516_v1 = vmin.f32 %v1219_v58, %v1221_v59  ;;  %v430_v3 = vmul.f32 2.0, %v400_v63  ;;  %v1261_v63 = vadd.s32 48, %v1243_v46 }
 0x102   : > { %v1227_v4 = vsub.f32 %v460_v2, %v429_v62  ;;  %v1258_v62 = vadd.s32 40, %v1243_v46 }
 0x103   : > { %v1229_v5 = vsub.f32 %v460_v2, %v430_v3  ;;  %v404_v6 = vpop.f32.mrb[10].mxu0 }
 0x104   : > { %v504_v7 = vmin.f32 %v502_v50, %v1227_v4  ;;  %v431_v8 = vmul.f32 2.0, %v404_v6  ;;  %v406_v9 = vpop.f32.mrb[11].mxu0 }
 0x105   : > { %v517_v11 = vmin.f32 %v515_v53, %v1229_v5  ;;  %v432_v12 = vmul.f32 2.0, %v406_v9 }
 0x106   : > { %v487_v13 = vsub.f32 %v465_v10, %v431_v8 }
 0x107   : > { %v1233_v14 = vsub.f32 %v465_v10, %v432_v12  ;;  %v410_v15 = vpop.f32.mrb[12].mxu0 }
 0x108   : > { %v505_v16 = vmin.f32 %v503_v61, %v487_v13  ;;  %v433_v17 = vmul.f32 2.0, %v410_v15  ;;  %v412_v18 = vpop.f32.mrb[13].mxu0 }
 0x109   : > { %v518_v20 = vmin.f32 %v516_v1, %v1233_v14  ;;  %v434_v21 = vmul.f32 2.0, %v412_v18  ;;  %v1264_v1 = vadd.s32 56, %v1243_v46 }
 0x10a   : > { %v489_v22 = vsub.f32 %v470_v19, %v433_v17 }
 0x10b   : > { %v1236_v23 = vsub.f32 %v470_v19, %v434_v21  ;;  %v416_v24 = vpop.f32.mrb[14].mxu0 }
 0x10c   : > { %v506_v25 = vmin.f32 %v504_v7, %v489_v22  ;;  %v435_v26 = vmul.f32 2.0, %v416_v24  ;;  %v418_v27 = vpop.f32.mrb[15].mxu0 }
 0x10d   : > { %v519_v29 = vmin.f32 %v517_v11, %v1236_v23  ;;  %v436_v30 = vmul.f32 2.0, %v418_v27 }
 0x10e   : > { %v491_v31 = vsub.f32 %v475_v28, %v435_v26 }
 0x10f   : > { %v1239_v32 = vsub.f32 %v475_v28, %v436_v30 }
 0x110   : > { %v507_v33 = vmin.f32 %v505_v16, %v491_v31 }
 0x111   : > { %v520_v34 = vmin.f32 %v518_v20, %v1239_v32 }
 0x112   : > { %v508_v35 = vmin.f32 %v506_v25, %v507_v33 }
 0x113   : > { %v521_v36 = vmin.f32 %v519_v29, %v520_v34 }
 0x114   : > { %v509_v37 = vrot.slane %v508_v35, 4 }
 0x115   : > { %v522_v39 = vrot.slane %v521_v36, 4 }
 0x116   : > { %v510_v40 = vmin.f32 %v508_v35, %v509_v37 }
 0x117   : > { %v523_v41 = vmin.f32 %v521_v36, %v522_v39 }
 0x118   : > { %v511_v43 = vrot.slane %v510_v40, 2 }
 0x119   : > { %v524_v47 = vrot.slane %v523_v41, 2 }
 0x11a   : > { %v512_v49 = vmin.f32 %v510_v40, %v511_v43 }
 0x11b   : > { %v525_v50 = vmin.f32 %v523_v41, %v524_v47 }
 0x11c   : > { %v513_v51 = vrot.slane %v512_v49, 1 }
 0x11d   : > { %v526_v53 = vrot.slane %v525_v50, 1 }
 0x11e   : > { %v514_v61 = vmin.f32 %v512_v49, %v513_v51  ;;  %v1086_v49 = vmov 1.0|1.0  }
 0x11f   : > { %v527_v2 = vmin.f32 %v525_v50, %v526_v53 }
 0x120   : > { %vm528_vm1 = vcmp.eq.f32.partialorder %v1203_v42, %v514_v61  ;;  %vm530_vm2 = vcmp.eq.f32.partialorder %v1215_v56, %v514_v61  ;;  %vm532_vm3 = vcmp.eq.f32.partialorder %v1205_v44, %v514_v61  ;;  %vm534_vm4 = vcmp.eq.f32.partialorder %v1217_v57, %v514_v61 }
 0x121   : > { %vm536_vm5 = vcmp.eq.f32.partialorder %v1227_v4, %v514_v61  ;;  %vm538_vm6 = vcmp.eq.f32.partialorder %v487_v13, %v514_v61  ;;  %vm540_vm7 = vcmp.eq.f32.partialorder %v489_v22, %v514_v61  ;;  %vm542_vm8 = vcmp.eq.f32.partialorder %v491_v31, %v514_v61 }
 0x122   : > { %v544_v3 = vsel %vm528_vm1, %v1243_v46, 64  ;;  %v546_v6 = vsel %vm530_vm2, %v1246_v52, 64  ;;  %v548_v7 = vsel %vm532_vm3, %v1249_v54, 64  ;;  %v550_v8 = vsel %vm534_vm4, %v1252_v55, 64 }
 0x123   : > { %v552_v42 = vsel %vm536_vm5, %v1255_v60, 64  ;;  %v554_v56 = vsel %vm538_vm6, %v1258_v62, 64  ;;  %v556_v44 = vsel %vm540_vm7, %v1261_v63, 64  ;;  %v558_v57 = vsel %vm542_vm8, %v1264_v1, 64 }
 0x124   : > { %vm560_vm9 = vcmp.lt.s32.totalorder %v544_v3, %v548_v7  ;;  %vm562_vm10 = vcmp.lt.s32.totalorder %v546_v6, %v550_v8  ;;  %vm529_vm11 = vcmp.eq.f32.partialorder %v1207_v45, %v527_v2  ;;  %vm531_vm12 = vcmp.eq.f32.partialorder %v1219_v58, %v527_v2 }
 0x125   : > { %v561_v4 = vsel %vm560_vm9, %v544_v3, %v548_v7  ;;  %v563_v9 = vsel %vm562_vm10, %v546_v6, %v550_v8  ;;  %vm533_vm13 = vcmp.eq.f32.partialorder %v1209_v48, %v527_v2  ;;  %vm535_vm14 = vcmp.eq.f32.partialorder %v1221_v59, %v527_v2 }
 0x126   : > { %vm564_vm15 = vcmp.lt.s32.totalorder %v561_v4, %v552_v42  ;;  %vm566_vm0 = vcmp.lt.s32.totalorder %v563_v9, %v554_v56  ;;  %vm537_vm1 = vcmp.eq.f32.partialorder %v1229_v5, %v527_v2  ;;  %vm539_vm2 = vcmp.eq.f32.partialorder %v1233_v14, %v527_v2 }
 0x127   : > { %v565_v10 = vsel %vm564_vm15, %v561_v4, %v552_v42  ;;  %v567_v11 = vsel %vm566_vm0, %v563_v9, %v554_v56  ;;  %vm541_vm3 = vcmp.eq.f32.partialorder %v1236_v23, %v527_v2  ;;  %vm543_vm4 = vcmp.eq.f32.partialorder %v1239_v32, %v527_v2 }
 0x128   : > { %vm568_vm5 = vcmp.lt.s32.totalorder %v565_v10, %v556_v44  ;;  %vm570_vm6 = vcmp.lt.s32.totalorder %v567_v11, %v558_v57  ;;  %v545_v12 = vsel %vm529_vm11, %v1243_v46, 64  ;;  %v547_v13 = vsel %vm531_vm12, %v1246_v52, 64 }
 0x129   : > { %v569_v15 = vsel %vm568_vm5, %v565_v10, %v556_v44  ;;  %v571_v16 = vsel %vm570_vm6, %v567_v11, %v558_v57  ;;  %v549_v17 = vsel %vm533_vm13, %v1249_v54, 64  ;;  %v551_v18 = vsel %vm535_vm14, %v1252_v55, 64 }
 0x12a   : > { %vm572_vm7 = vcmp.lt.s32.totalorder %v569_v15, %v571_v16  ;;  %v553_v45 = vsel %vm537_vm1, %v1255_v60, 64  ;;  %vm583_vm8 = vcmp.lt.s32.totalorder %v545_v12, %v549_v17  ;;  %vm585_vm9 = vcmp.lt.s32.totalorder %v547_v13, %v551_v18 }
 0x12b   : > { %v573_v19 = vsel %vm572_vm7, %v569_v15, %v571_v16  ;;  %v555_v20 = vsel %vm539_vm2, %v1258_v62, 64  ;;  %v584_v21 = vsel %vm583_vm8, %v545_v12, %v549_v17  ;;  %v586_v48 = vsel %vm585_vm9, %v547_v13, %v551_v18 }
 0x12c   : > { %v574_v58 = vrot.slane %v573_v19, 4  ;;  %v557_v59 = vsel %vm541_vm3, %v1261_v63, 64  ;;  %vm587_vm10 = vcmp.lt.s32.totalorder %v584_v21, %v553_v45  ;;  %vm589_vm11 = vcmp.lt.s32.totalorder %v586_v48, %v555_v20 }
 0x12d   : > { %v559_v5 = vsel %vm543_vm4, %v1264_v1, 64  ;;  %v588_v22 = vsel %vm587_vm10, %v584_v21, %v553_v45  ;;  %v590_v24 = vsel %vm589_vm11, %v586_v48, %v555_v20  ;;  %v1085_v31 = vmov 1966171168  }
 0x12e   : > { %vm575_vm12 = vcmp.lt.s32.totalorder %v573_v19, %v574_v58  ;;  %vm591_vm13 = vcmp.lt.s32.totalorder %v588_v22, %v557_v59  ;;  %vm593_vm14 = vcmp.lt.s32.totalorder %v590_v24, %v559_v5  ;;  %v798_v33 = vunpack.c.l.s4 %v1085_v31 }
 0x12f   : > { %v576_v25 = vsel %vm575_vm12, %v573_v19, %v574_v58  ;;  %v592_v26 = vsel %vm591_vm13, %v588_v22, %v557_v59  ;;  %v594_v27 = vsel %vm593_vm14, %v590_v24, %v559_v5  ;;  %vm813_vm13 = vcmp.lt.s32.totalorder %v493_v38, 256  ;;  %v670_v38 = vpop.trf.xlu0 }
 0x130   : > { %v577_v14 = vrot.slane %v576_v25, 2  ;;  %vm595_vm15 = vcmp.lt.s32.totalorder %v592_v26, %v594_v27  ;;  %v799_v35 = vunpack.c.0.s8 %v798_v33 }
 0x131   : > { %v596_v28 = vsel %vm595_vm15, %v592_v26, %v594_v27 }
 0x132   : > { %vm578_vm0 = vcmp.lt.s32.totalorder %v576_v25, %v577_v14  ;;  %v597_v29 = vrot.slane %v596_v28, 4  ;;  %v802_v40 = vsub.s32 %v799_v35, %v1243_v46 }
 0x133   : > { %v579_v23 = vsel %vm578_vm0, %v576_v25, %v577_v14  ;;  %v671_v50 = vpop.trf.xlu0 }
 0x134   : > { %v580_v30 = vrot.slane %v579_v23, 1  ;;  %vm598_vm1 = vcmp.lt.s32.totalorder %v596_v28, %v597_v29 }
 0x135   : > { %v599_v32 = vsel %vm598_vm1, %v596_v28, %v597_v29 }
 0x136   : > { %v600_v34 = vrot.slane %v599_v32, 2  ;;  %vm581_vm2 = vcmp.lt.s32.totalorder %v579_v23, %v580_v30 }
 0x137   : > { %v582_v37 = vsel %vm581_vm2, %v579_v23, %v580_v30  ;;  %v672_v51 = vpop.trf.xlu0 }
 0x138   : > { %vm601_vm3 = vcmp.lt.s32.totalorder %v599_v32, %v600_v34  ;;  %vm606_vm5 = vcmp.eq.s32.totalorder %v1243_v46, %v582_v37  ;;  %vm608_vm6 = vcmp.eq.s32.totalorder %v1246_v52, %v582_v37  ;;  %vm610_vm15 = vcmp.eq.s32.totalorder %v1249_v54, %v582_v37 }
 0x139   : > { %v602_v36 = vsel %vm601_vm3, %v599_v32, %v600_v34  ;;  %vm1015_vm12 = vmpackc.low %vm608_vm6, %vm606_vm5  ;;  %vm612_vm0 = vcmp.eq.s32.totalorder %v1252_v55, %v582_v37  ;;  %vm614_vm5 = vcmp.eq.s32.totalorder %v1255_v60, %v582_v37  ;;  %vm616_vm6 = vcmp.eq.s32.totalorder %v1258_v62, %v582_v37 }
 0x13a   : > { %v603_v39 = vrot.slane %v602_v36, 1  ;;  %vm1019_vm3 = vmpackc.low %vm612_vm0, %vm610_vm15 }
 0x13c   : > { %vm604_vm4 = vcmp.lt.s32.totalorder %v602_v36, %v603_v39 }
 0x13d   : > { %v605_v41 = vsel %vm604_vm4, %v602_v36, %v603_v39 }
 0x13e   : > { %v796_v43 = vcombine.low %v582_v37, %v605_v41  ;;  %vm607_vm7 = vcmp.eq.s32.totalorder %v1243_v46, %v605_v41  ;;  %vm609_vm8 = vcmp.eq.s32.totalorder %v1246_v52, %v605_v41  ;;  %vm611_vm9 = vcmp.eq.s32.totalorder %v1249_v54, %v605_v41  ;;  %v673_v52 = vpop.trf.xlu0 }
 0x13f   : > { %vm1013_vm10 = vmpackc.low %vm609_vm8, %vm607_vm7  ;;  %vm613_vm11 = vcmp.eq.s32.totalorder %v1252_v55, %v605_v41  ;;  %vm615_vm1 = vcmp.eq.s32.totalorder %v1255_v60, %v605_v41  ;;  %vm617_vm2 = vcmp.eq.s32.totalorder %v1258_v62, %v605_v41  ;;  %vm619_vm7 = vcmp.eq.s32.totalorder %v1261_v63, %v605_v41 }
 0x140   : > { %v803_v47 = vrot.slane %v796_v43, %v802_v40  ;;  %1014 = vmatprep.subr.msk.bf16.mxu1 %vm1013_vm10, %v1086_v49  ;;  %vm1017_vm14 = vmpackc.low %vm613_vm11, %vm611_vm9  ;;  %vm621_vm8 = vcmp.eq.s32.totalorder %v1264_v1, %v605_v41  ;;  %vm618_vm11 = vcmp.eq.s32.totalorder %v1261_v63, %v582_v37 }
 0x141   : > { %1016 = vmatpush1.bf16.msk.msra.mxu1 %vm1015_vm12, %v1086_v49  ;;  %vm1021_vm4 = vmpackc.low %vm617_vm2, %vm615_vm1  ;;  %vm620_vm12 = vcmp.eq.s32.totalorder %v1264_v1, %v582_v37 }
 0x142   : > { %v810_v46 = vrot.slane %v803_v47, %v802_v40  ;;  %1018 = vmatprep.subr.msk.bf16.mxu1 %vm1017_vm14, %v1086_v49  ;;  %vm1023_vm9 = vmpackc.low %vm616_vm6, %vm614_vm5  ;;  %vm686_vm14 = vcmask 523264  }
 0x143   : > { %vm1025_vm10 = vmpackc.low %vm621_vm8, %vm619_vm7 }
 0x144   : > { %815 = vst.msk [vmem:[%s257_s11] sm:$0x3] %vm813_vm13, %v810_v46  ;;  %vm1027_vm13 = vmpackc.low %vm620_vm12, %vm618_vm11 }
 0x145   : > { %1020 = vmatpush1.bf16.msk.msra.mxu1 %vm1019_vm3, %v1086_v49 }
 0x146   : > { %1022 = vmatprep.subr.msk.bf16.mxu1 %vm1021_vm4, %v1086_v49 }
 0x149   : > { %1024 = vmatpush1.bf16.msk.msra.mxu1 %vm1023_vm9, %v1086_v49 }
 0x14a   : > { %1026 = vmatprep.subr.msk.bf16.mxu1 %vm1025_vm10, %v1086_v49 }
 0x14d   : > { %1028 = vmatpush1.bf16.msk.msra.mxu1 %vm1027_vm13, %v1086_v49 }
 0x150   : > { %997 = vmatmul.mubr.msk.f32.vlgmr.msra.gmra.mrb[0].mxu1 %vm686_vm14, %v670_v38 }
 0x151   : > { %769 = vmatprep.mubr.f32.mxu1 %v1083_v0 }
 0x154   : > { %998 = vmatmul.mubr.msk.f32.gmra.mrb[2].mxu1 %vm686_vm14, %v671_v50 }
 0x155   : > { %775 = vmatprep.mubr.f32.mxu1 %v1083_v0 }
 0x158   : > { %999 = vmatmul.mubr.msk.f32.gmra.mrb[4].mxu1 %vm686_vm14, %v672_v51 }
 0x159   : > { %781 = vmatprep.mubr.f32.mxu1 %v1083_v0 }
 0x15c   : > { %1000 = vmatmul.mubr.msk.f32.gmra.mrb[6].mxu1 %vm686_vm14, %v673_v52 }
 0x223   : > { %v765_v53 = vpop.f32.mrb[0].mxu1 }
 0x224   : > { %788 = vst [vmem:[%s248_s14] sm:$0xff] %v765_v53  ;;  %v767_v54 = vpop.f32.mrb[1].mxu1 }
 0x225   : > { %789 = vst [vmem:[%s248_s14 + $0x8] sm:$0xff] %v767_v54 }
 0x227   : > { %v771_v55 = vpop.f32.mrb[2].mxu1 }
 0x228   : > { %790 = vst [vmem:[%s248_s14 + $0x10] sm:$0xff] %v771_v55  ;;  %v773_v60 = vpop.f32.mrb[3].mxu1 }
 0x229   : > { %791 = vst [vmem:[%s248_s14 + $0x18] sm:$0xff] %v773_v60 }
 0x22b   : > { %v777_v61 = vpop.f32.mrb[4].mxu1 }
 0x22c   : > { %792 = vst [vmem:[%s248_s14 + $0x20] sm:$0xff] %v777_v61  ;;  %v779_v62 = vpop.f32.mrb[5].mxu1 }
 0x22d   : > { %793 = vst [vmem:[%s248_s14 + $0x28] sm:$0xff] %v779_v62 }
 0x22f   : > { %v783_v63 = vpop.f32.mrb[6].mxu1 }
 0x230   : > { %794 = vst [vmem:[%s248_s14 + $0x30] sm:$0xff] %v783_v63  ;;  %v785_v0 = vpop.f32.mrb[7].mxu1 }
 0x231   : > { %795 = vst [vmem:[%s248_s14 + $0x38] sm:$0xff] %v785_v0 }
 0x232 PF: > { %s15_s17 = sadd.s32 1, %s1081_s17   ;;  %s1355_s15 = smov %s1077_s16 }
 0x233   : > { %p12_p5 = scmp.ge.s32.totalorder %s15_s17, 4   ;;  %s1356_s16 = smov %s1358_s18 }
 0x235   :  { %14 = sbr.rel (!%p12_p5) target bundleno = 2 (0x2), region = 74 }

</bundles_post_ra>
